<compile_context>
chip_gen: v7x
topology: tpu7x:2x2x1
jax: 0.10.0
libtpu: 0.0.40
codegen_flags: <defaults>
</compile_context>

<pallas_src>
import functools

import jax
import jax.numpy as jnp
from jax.experimental import pallas as pl
from jax.experimental.pallas import tpu as pltpu


# ~4 MiB (f32) output block => ~8 MiB double-buffered: large enough to hide the
# per-grid-step overhead, small enough for v7x's 64 MiB (32 MiB scoped) VMEM.
_BLOCK_ELEMS = 1 << 20


# --------------------- separable kernel (main path) -------------------------

def _separable_raster_kernel(py_ref, px_ref, gy_ref, gx_ref, out_ref, *,
                             n_prims, neg_inv_sigma2, contrast):
    """One grid step == (batch element, H tile, W tile).

    py_ref / px_ref : SMEM f32[B, N]   decoded point coords (y, x) in [-1, 1]
    gy_ref          : VMEM f32[Ht, 1]  raster-grid row (y) coordinates for this tile
    gx_ref          : VMEM f32[1, Wt]  raster-grid column (x) coordinates for this tile
    out_ref         : VMEM f32[Ht, Wt] (1 - prod_n(1 - exp(-edt2/sigma2))) * contrast
    """
    b = pl.program_id(0)
    gy = gy_ref[...]                       # (Ht, 1)
    gx = gx_ref[...]                       # (1, Wt)

    def one_minus_raster(n):
        # Separable Gaussian: only Ht + Wt exps per primitive (EUP), then the
        # per-pixel work is a single outer-product multiply chain on the VPU.
        dy = gy - py_ref[b, n]                              # (Ht, 1)
        dx = gx - px_ref[b, n]                              # (1, Wt)
        fy = jnp.exp(dy * dy * neg_inv_sigma2)              # (Ht, 1)
        fx = jnp.exp(dx * dx * neg_inv_sigma2)              # (1, Wt)
        return 1.0 - fy * fx                                # (Ht, Wt): ~3 VPU ops/pixel

    # softor(...) == 1 - prod_n(1 - raster_n); init from n = 0 (no ones-multiply).
    # TODO(synk): for large n_prims (>~32) move the primitive axis to a trailing
    # "arbitrary" grid dimension with a resident accumulator block (P3).
    acc = one_minus_raster(0)
    for n in range(1, n_prims):
        acc = acc * one_minus_raster(n)

    out_ref[...] = ((1.0 - acc) * contrast).astype(out_ref.dtype)


def _pick_separable_tiles(h, w):
    """Ht: multiple-of-8 divisor of h (or full h); Wt: multiple-of-128 divisor of w
    (or full w); product capped at _BLOCK_ELEMS.  Largest tiles win (amortize the
    ~0.35us per-step overhead); cross-core parallelism comes from the batch axis."""
    wt = None
    w_cap = max(128, _BLOCK_ELEMS // 8)
    for d in range(128, min(w, w_cap) + 1, 128):
        if w % d == 0:
            wt = d
    if wt is None:
        wt = w                            # caller guarantees w % 128 == 0 normally

    ht = None
    h_cap = max(8, _BLOCK_ELEMS // wt)
    for d in range(8, min(h, h_cap) + 1, 8):
        if h % d == 0:
            ht = d
    if ht is None:
        ht = h                            # h < 8 or not a multiple of 8: full extent
    return ht, wt


def _raster_separable(py, px, grid_y, grid_x, neg_inv_sigma2, contrast):
    B, N = py.shape
    H, W = grid_y.shape
    ht, wt = _pick_separable_tiles(H, W)

    # The raster grid comes from a meshgrid of 1-D linspaces, so its y coordinate
    # only varies along rows and its x coordinate only along columns.
    gyc = grid_y[:, :1].astype(jnp.float32)        # (H, 1)
    gxr = grid_x[:1, :].astype(jnp.float32)        # (1, W)

    kern = functools.partial(_separable_raster_kernel, n_prims=N,
                             neg_inv_sigma2=neg_inv_sigma2, contrast=contrast)

    block_bytes = ht * wt * 4
    vmem_limit = int(min(48 * 1024 * 1024, max(32 * 1024 * 1024, 4 * block_bytes)))

    out = pl.pallas_call(
        kern,
        out_shape=jax.ShapeDtypeStruct((B, H, W), jnp.float32),
        grid=(B, H // ht, W // wt),
        in_specs=[
            pl.BlockSpec(memory_space=pltpu.MemorySpace.SMEM),   # py (B, N) scalars
            pl.BlockSpec(memory_space=pltpu.MemorySpace.SMEM),   # px (B, N) scalars
            pl.BlockSpec((ht, 1), lambda b, hi, wi: (hi, 0)),    # grid-y column
            pl.BlockSpec((1, wt), lambda b, hi, wi: (0, wi)),    # grid-x row
        ],
        out_specs=pl.BlockSpec((None, ht, wt), lambda b, hi, wi: (b, hi, wi)),
        compiler_params=pltpu.CompilerParams(
            dimension_semantics=("parallel", "parallel", "parallel"),
            vmem_limit_bytes=vmem_limit),
    )(py, px, gyc, gxr)

    return out.reshape(B, 1, H, W)


# -------------------- flat-HW kernel (W < 128 fallback) ---------------------

def _flat_raster_kernel(py_ref, px_ref, gy_ref, gx_ref, out_ref, *,
                        n_prims, neg_inv_sigma2, contrast):
    """One grid step == one HW tile over the full (small) batch.

    py_ref / px_ref : VMEM f32[B, N]    decoded point coords
    gy_ref / gx_ref : VMEM f32[1, HWt]  flattened raster-grid coords for this tile
    out_ref         : VMEM f32[B, HWt]
    """
    # Hoist the (1, HWt) -> (B, HWt) broadcasts out of the primitive loop
    # (JAX does not CSE broadcast_in_dim).
    gy = jnp.broadcast_to(gy_ref[...], out_ref.shape)
    gx = jnp.broadcast_to(gx_ref[...], out_ref.shape)
    py = py_ref[...]                       # (B, N)
    px = px_ref[...]

    def one_minus_raster(n):
        dy = gy - py[:, n:n + 1]
        dx = gx - px[:, n:n + 1]
        edt2 = dy * dy + dx * dx                         # fused create_edt2
        return 1.0 - jnp.exp(edt2 * neg_inv_sigma2)

    acc = one_minus_raster(0)
    for n in range(1, n_prims):
        acc = acc * one_minus_raster(n)

    out_ref[...] = ((1.0 - acc) * contrast).astype(out_ref.dtype)


def _pick_flat_hw_tile(hw, b):
    """Largest multiple-of-128 divisor of hw with b*hwt under the element budget;
    full extent if hw is not a multiple of 128 (masked stores, still correct)."""
    best = None
    cap = max(128, _BLOCK_ELEMS // max(b, 1))
    for d in range(128, min(hw, cap) + 1, 128):
        if hw % d == 0:
            best = d
    # TODO(synk): hw % 128 != 0 falls back to a full-extent (masked-store) block.
    return best if best is not None else hw


def _raster_flat(py, px, grid_y, grid_x, neg_inv_sigma2, contrast):
    B, N = py.shape
    H, W = grid_y.shape
    HW = H * W

    gy = grid_y.reshape(1, HW).astype(jnp.float32)
    gx = grid_x.reshape(1, HW).astype(jnp.float32)

    hwt = _pick_flat_hw_tile(HW, B)
    kern = functools.partial(_flat_raster_kernel, n_prims=N,
                             neg_inv_sigma2=neg_inv_sigma2, contrast=contrast)

    block_bytes = B * hwt * 4
    vmem_limit = int(min(48 * 1024 * 1024, max(32 * 1024 * 1024, 4 * block_bytes)))

    out = pl.pallas_call(
        kern,
        out_shape=jax.ShapeDtypeStruct((B, HW), jnp.float32),
        grid=(HW // hwt,),
        in_specs=[
            pl.BlockSpec((B, N), lambda hi: (0, 0)),      # full (no 8-row padding)
            pl.BlockSpec((B, N), lambda hi: (0, 0)),
            pl.BlockSpec((1, hwt), lambda hi: (0, hi)),
            pl.BlockSpec((1, hwt), lambda hi: (0, hi)),
        ],
        out_specs=pl.BlockSpec((B, hwt), lambda hi: (0, hi)),
        compiler_params=pltpu.CompilerParams(
            dimension_semantics=("parallel",),
            vmem_limit_bytes=vmem_limit),
    )(py, px, gy, gx)

    return out.reshape(B, 1, H, W)


# --------------------------- dispatch wrapper --------------------------------

def raster_soft_fused_pallas(points, grid_y, grid_x, sigma2, contrast):
    """Fused create_edt2 + raster_soft + contrast; edt2 never touches HBM.

    points : f32[B, N, 2]  decoded primitive coordinates (y, x) in [-1, 1]
    grid_y : f32[H, W]     raster-grid y coordinates in [-1, 1]
    grid_x : f32[H, W]     raster-grid x coordinates in [-1, 1]
    returns f32[B, 1, H, W]
    """
    H, W = grid_y.shape
    py = points[..., 0].astype(jnp.float32)              # (B, N)
    px = points[..., 1].astype(jnp.float32)              # (B, N)

    # TODO(synk): sigma2/contrast are folded as compile-time constants, matching the
    # fixed-scalar get_sigma2 here; pass them as SMEM scalars if they become traced.
    neg_inv_sigma2 = -1.0 / float(sigma2)
    contrast = float(contrast)

    if W % 128 == 0:
        # lane-dense separable path (3 VPU ops/pixel, no per-pixel exp)
        return _raster_separable(py, px, grid_y, grid_x, neg_inv_sigma2, contrast)
    # small-width fallback: lane-dense over flattened HW
    return _raster_flat(py, px, grid_y, grid_x, neg_inv_sigma2, contrast)


# ------------------- Concrete Decoder realization (glue) -------------------

class PointDecoderPallas:
    """Minimal concrete realization of the abstract dsketch Decoder.

    decode_to_params: linear + tanh -> N 2-D points in [-1, 1]
    create_edt2:      squared euclidean distance of each point to a [-1, 1]^2 grid
                      (kept as a method for the reference; fused in-kernel)
    get_sigma2:       fixed scalar
    forward:          Decoder.forward (state=None path)
    """

    def __init__(self, latent_dim, n_prims, height, width,
                 sigma2=0.05, contrast=2.0, key=None):
        self.n_prims = n_prims
        self.height = height
        self.width = width
        self.sigma2 = float(sigma2)
        self.contrast = float(contrast)
        k_w, k_b = jax.random.split(key)
        # deterministic synthetic parameters (no checkpoint loading)
        self.weight = jax.random.normal(
            k_w, (latent_dim, 2 * n_prims), dtype=jnp.float32) * 0.5
        self.bias = jax.random.normal(
            k_b, (2 * n_prims,), dtype=jnp.float32) * 0.1
        # raster grid in [-1, 1] (same convention as dsketch grids)
        gy = jnp.linspace(-1.0, 1.0, height, dtype=jnp.float32)
        gx = jnp.linspace(-1.0, 1.0, width, dtype=jnp.float32)
        self.grid_y, self.grid_x = jnp.meshgrid(gy, gx, indexing="ij")

    def decode_to_params(self, inp):
        # inp: [B, latent_dim] -> points [B, N, 2]
        p = jnp.tanh(inp @ self.weight + self.bias)
        return p.reshape(inp.shape[0], self.n_prims, 2)

    def get_sigma2(self, params):
        return self.sigma2

    def create_edt2(self, params):
        # reference-only path: params [B, N, 2] -> edt2 [B, N, H, W]
        py = params[..., 0][:, :, None, None]
        px = params[..., 1][:, :, None, None]
        dy = self.grid_y[None, None, :, :] - py
        dx = self.grid_x[None, None, :, :] - px
        return dy * dy + dx * dx

    def forward(self, inp, state=None):
        params = self.decode_to_params(inp)
        sigma2 = self.get_sigma2(params)
        # create_edt2 + raster_soft + contrast fused into one Pallas kernel.
        images = raster_soft_fused_pallas(params, self.grid_y, self.grid_x,
                                          sigma2, self.contrast)
        # TODO(synk): state[HARDRASTER]/state[SQ_DISTANCE_TRANSFORM] side outputs
        # (raster_hard / nearest-neighbour path) not implemented; state=None only.
        return images


# ------------------------------- reference ---------------------------------

def _raster_soft_ref(edt2, sigma2, contrast):
    rasters = jnp.exp(-edt2 / sigma2)
    return (1.0 - jnp.prod(1.0 - rasters, axis=1, keepdims=True)) * contrast


if __name__ == "__main__":
    key = jax.random.PRNGKey(0)
    k1, k2, k3, k4 = jax.random.split(key, 4)

    # ---- Config 1: lane-dense separable path (W multiple of 128) ----
    B, LATENT, N_PRIMS, H, W = 2, 32, 4, 16, 128
    dec = PointDecoderPallas(LATENT, N_PRIMS, H, W,
                             sigma2=0.05, contrast=2.0, key=k1)
    x = jax.random.normal(k2, (B, LATENT), dtype=jnp.float32)
    images = jax.block_until_ready(dec.forward(x))

    params = dec.decode_to_params(x)
    ref = _raster_soft_ref(dec.create_edt2(params),
                           dec.get_sigma2(params), dec.contrast)
    assert images.shape == (B, 1, H, W)
    assert jnp.allclose(images, ref, atol=1e-5, rtol=1e-5), \
        float(jnp.max(jnp.abs(images - ref)))

    # ---- Config 2: small-W fallback path (flat HW layout), odd B / N ----
    B2, N2, H2, W2 = 3, 5, 16, 16
    dec2 = PointDecoderPallas(LATENT, N2, H2, W2,
                              sigma2=0.02, contrast=1.0, key=k3)
    x2 = jax.random.normal(k4, (B2, LATENT), dtype=jnp.float32)
    images2 = jax.block_until_ready(dec2.forward(x2))

    params2 = dec2.decode_to_params(x2)
    ref2 = _raster_soft_ref(dec2.create_edt2(params2),
                            dec2.get_sigma2(params2), dec2.contrast)
    assert images2.shape == (B2, 1, H2, W2)
    assert jnp.allclose(images2, ref2, atol=1e-5, rtol=1e-5), \
        float(jnp.max(jnp.abs(images2 - ref2)))

    print("KERNEL_OK")
</pallas_src>

<mosaic_0001>
module attributes {stable_mosaic.version = 11 : i64} {
  func.func @_separable_raster_kernel(%arg0: i32, %arg1: i32, %arg2: i32, %arg3: memref<2x4xf32, #tpu.memory_space<smem>>, %arg4: memref<2x4xf32, #tpu.memory_space<smem>>, %arg5: memref<16x1xf32, #tpu.memory_space<vmem>>, %arg6: memref<1x128xf32, #tpu.memory_space<vmem>>, %arg7: memref<1x16x128xf32, #tpu.memory_space<vmem>>) attributes {dimension_semantics = [#tpu.dimension_semantics<parallel>, #tpu.dimension_semantics<parallel>, #tpu.dimension_semantics<parallel>], iteration_bounds = array<i64: 2, 1, 1>, scalar_prefetch = 0 : i64, scratch_operands = 0 : i64, tpu.core_type = #tpu.core_type<tc>, window_params = [{transform_indices = @transform_0, window_bounds = array<i64: 2, 4>}, {transform_indices = @transform_1, window_bounds = array<i64: 2, 4>}, {transform_indices = @transform_2, window_bounds = array<i64: 16, 1>}, {transform_indices = @transform_3, window_bounds = array<i64: 1, 128>}, {transform_indices = @transform_4, window_bounds = array<i64: 1, 16, 128>}]} {
    %c0 = arith.constant 0 : index
    %c0_0 = arith.constant 0 : index
    %0 = vector.load %arg5[%c0, %c0_0] : memref<16x1xf32, #tpu.memory_space<vmem>>, vector<16x1xf32>
    %c0_1 = arith.constant 0 : index
    %c0_2 = arith.constant 0 : index
    %1 = vector.load %arg6[%c0_1, %c0_2] : memref<1x128xf32, #tpu.memory_space<vmem>>, vector<1x128xf32>
    %2 = arith.index_cast %arg0 : i32 to index
    %c0_3 = arith.constant 0 : index
    %3 = memref.load %arg3[%2, %c0_3] : memref<2x4xf32, #tpu.memory_space<smem>>
    %4 = vector.broadcast %3 : f32 to vector<16x1xf32>
    %5 = arith.subf %0, %4 : vector<16x1xf32>
    %6 = arith.index_cast %arg0 : i32 to index
    %c0_4 = arith.constant 0 : index
    %7 = memref.load %arg4[%6, %c0_4] : memref<2x4xf32, #tpu.memory_space<smem>>
    %8 = vector.broadcast %7 : f32 to vector<1x128xf32>
    %9 = arith.subf %1, %8 : vector<1x128xf32>
    %10 = arith.mulf %5, %5 : vector<16x1xf32>
    %cst = arith.constant -2.000000e+01 : f32
    %11 = vector.broadcast %cst : f32 to vector<16x1xf32>
    %12 = arith.mulf %10, %11 : vector<16x1xf32>
    %13 = math.exp %12 : vector<16x1xf32>
    %14 = arith.mulf %9, %9 : vector<1x128xf32>
    %cst_5 = arith.constant -2.000000e+01 : f32
    %15 = vector.broadcast %cst_5 : f32 to vector<1x128xf32>
    %16 = arith.mulf %14, %15 : vector<1x128xf32>
    %17 = math.exp %16 : vector<1x128xf32>
    %18 = vector.broadcast %13 : vector<16x1xf32> to vector<16x128xf32>
    %19 = vector.broadcast %17 : vector<1x128xf32> to vector<16x128xf32>
    %20 = arith.mulf %18, %19 : vector<16x128xf32>
    %cst_6 = arith.constant 1.000000e+00 : f32
    %21 = vector.broadcast %cst_6 : f32 to vector<16x128xf32>
    %22 = arith.subf %21, %20 : vector<16x128xf32>
    %23 = arith.index_cast %arg0 : i32 to index
    %c1 = arith.constant 1 : index
    %24 = memref.load %arg3[%23, %c1] : memref<2x4xf32, #tpu.memory_space<smem>>
    %25 = vector.broadcast %24 : f32 to vector<16x1xf32>
    %26 = arith.subf %0, %25 : vector<16x1xf32>
    %27 = arith.index_cast %arg0 : i32 to index
    %c1_7 = arith.constant 1 : index
    %28 = memref.load %arg4[%27, %c1_7] : memref<2x4xf32, #tpu.memory_space<smem>>
    %29 = vector.broadcast %28 : f32 to vector<1x128xf32>
    %30 = arith.subf %1, %29 : vector<1x128xf32>
    %31 = arith.mulf %26, %26 : vector<16x1xf32>
    %cst_8 = arith.constant -2.000000e+01 : f32
    %32 = vector.broadcast %cst_8 : f32 to vector<16x1xf32>
    %33 = arith.mulf %31, %32 : vector<16x1xf32>
    %34 = math.exp %33 : vector<16x1xf32>
    %35 = arith.mulf %30, %30 : vector<1x128xf32>
    %cst_9 = arith.constant -2.000000e+01 : f32
    %36 = vector.broadcast %cst_9 : f32 to vector<1x128xf32>
    %37 = arith.mulf %35, %36 : vector<1x128xf32>
    %38 = math.exp %37 : vector<1x128xf32>
    %39 = vector.broadcast %34 : vector<16x1xf32> to vector<16x128xf32>
    %40 = vector.broadcast %38 : vector<1x128xf32> to vector<16x128xf32>
    %41 = arith.mulf %39, %40 : vector<16x128xf32>
    %cst_10 = arith.constant 1.000000e+00 : f32
    %42 = vector.broadcast %cst_10 : f32 to vector<16x128xf32>
    %43 = arith.subf %42, %41 : vector<16x128xf32>
    %44 = arith.mulf %22, %43 : vector<16x128xf32>
    %45 = arith.index_cast %arg0 : i32 to index
    %c2 = arith.constant 2 : index
    %46 = memref.load %arg3[%45, %c2] : memref<2x4xf32, #tpu.memory_space<smem>>
    %47 = vector.broadcast %46 : f32 to vector<16x1xf32>
    %48 = arith.subf %0, %47 : vector<16x1xf32>
    %49 = arith.index_cast %arg0 : i32 to index
    %c2_11 = arith.constant 2 : index
    %50 = memref.load %arg4[%49, %c2_11] : memref<2x4xf32, #tpu.memory_space<smem>>
    %51 = vector.broadcast %50 : f32 to vector<1x128xf32>
    %52 = arith.subf %1, %51 : vector<1x128xf32>
    %53 = arith.mulf %48, %48 : vector<16x1xf32>
    %cst_12 = arith.constant -2.000000e+01 : f32
    %54 = vector.broadcast %cst_12 : f32 to vector<16x1xf32>
    %55 = arith.mulf %53, %54 : vector<16x1xf32>
    %56 = math.exp %55 : vector<16x1xf32>
    %57 = arith.mulf %52, %52 : vector<1x128xf32>
    %cst_13 = arith.constant -2.000000e+01 : f32
    %58 = vector.broadcast %cst_13 : f32 to vector<1x128xf32>
    %59 = arith.mulf %57, %58 : vector<1x128xf32>
    %60 = math.exp %59 : vector<1x128xf32>
    %61 = vector.broadcast %56 : vector<16x1xf32> to vector<16x128xf32>
    %62 = vector.broadcast %60 : vector<1x128xf32> to vector<16x128xf32>
    %63 = arith.mulf %61, %62 : vector<16x128xf32>
    %cst_14 = arith.constant 1.000000e+00 : f32
    %64 = vector.broadcast %cst_14 : f32 to vector<16x128xf32>
    %65 = arith.subf %64, %63 : vector<16x128xf32>
    %66 = arith.mulf %44, %65 : vector<16x128xf32>
    %67 = arith.index_cast %arg0 : i32 to index
    %c3 = arith.constant 3 : index
    %68 = memref.load %arg3[%67, %c3] : memref<2x4xf32, #tpu.memory_space<smem>>
    %69 = vector.broadcast %68 : f32 to vector<16x1xf32>
    %70 = arith.subf %0, %69 : vector<16x1xf32>
    %71 = arith.index_cast %arg0 : i32 to index
    %c3_15 = arith.constant 3 : index
    %72 = memref.load %arg4[%71, %c3_15] : memref<2x4xf32, #tpu.memory_space<smem>>
    %73 = vector.broadcast %72 : f32 to vector<1x128xf32>
    %74 = arith.subf %1, %73 : vector<1x128xf32>
    %75 = arith.mulf %70, %70 : vector<16x1xf32>
    %cst_16 = arith.constant -2.000000e+01 : f32
    %76 = vector.broadcast %cst_16 : f32 to vector<16x1xf32>
    %77 = arith.mulf %75, %76 : vector<16x1xf32>
    %78 = math.exp %77 : vector<16x1xf32>
    %79 = arith.mulf %74, %74 : vector<1x128xf32>
    %cst_17 = arith.constant -2.000000e+01 : f32
    %80 = vector.broadcast %cst_17 : f32 to vector<1x128xf32>
    %81 = arith.mulf %79, %80 : vector<1x128xf32>
    %82 = math.exp %81 : vector<1x128xf32>
    %83 = vector.broadcast %78 : vector<16x1xf32> to vector<16x128xf32>
    %84 = vector.broadcast %82 : vector<1x128xf32> to vector<16x128xf32>
    %85 = arith.mulf %83, %84 : vector<16x128xf32>
    %cst_18 = arith.constant 1.000000e+00 : f32
    %86 = vector.broadcast %cst_18 : f32 to vector<16x128xf32>
    %87 = arith.subf %86, %85 : vector<16x128xf32>
    %88 = arith.mulf %66, %87 : vector<16x128xf32>
    %cst_19 = arith.constant 1.000000e+00 : f32
    %89 = vector.broadcast %cst_19 : f32 to vector<16x128xf32>
    %90 = arith.subf %89, %88 : vector<16x128xf32>
    %cst_20 = arith.constant 2.000000e+00 : f32
    %91 = vector.broadcast %cst_20 : f32 to vector<16x128xf32>
    %92 = arith.mulf %90, %91 : vector<16x128xf32>
    %c0_21 = arith.constant 0 : index
    %c0_22 = arith.constant 0 : index
    %c0_23 = arith.constant 0 : index
    %93 = vector.load %arg7[%c0_21, %c0_22, %c0_23] : memref<1x16x128xf32, #tpu.memory_space<vmem>>, vector<1x16x128xf32>
    %94 = vector.shape_cast %93 : vector<1x16x128xf32> to vector<16x128xf32>
    %95 = vector.shape_cast %92 : vector<16x128xf32> to vector<1x16x128xf32>
    tpu.vector_store %arg7[%c0_21, %c0_22, %c0_23], %95 {strides = array<i32>} : memref<1x16x128xf32, #tpu.memory_space<vmem>>, vector<1x16x128xf32>,
    return
  }
  func.func @transform_0(%arg0: i32, %arg1: i32, %arg2: i32) -> (i32, i32) {
    %c0_i32 = arith.constant 0 : i32
    %c0_i32_0 = arith.constant 0 : i32
    %c0_i32_1 = arith.constant 0 : i32
    return %c0_i32, %c0_i32_0 : i32, i32
  }
  func.func @transform_1(%arg0: i32, %arg1: i32, %arg2: i32) -> (i32, i32) {
    %c0_i32 = arith.constant 0 : i32
    %c0_i32_0 = arith.constant 0 : i32
    %c0_i32_1 = arith.constant 0 : i32
    return %c0_i32, %c0_i32_0 : i32, i32
  }
  func.func @transform_2(%arg0: i32, %arg1: i32, %arg2: i32) -> (i32, i32) {
    %c0_i32 = arith.constant 0 : i32
    %c0_i32_0 = arith.constant 0 : i32
    return %arg1, %c0_i32 : i32, i32
  }
  func.func @transform_3(%arg0: i32, %arg1: i32, %arg2: i32) -> (i32, i32) {
    %c0_i32 = arith.constant 0 : i32
    %c0_i32_0 = arith.constant 0 : i32
    return %c0_i32, %arg2 : i32, i32
  }
  func.func @transform_4(%arg0: i32, %arg1: i32, %arg2: i32) -> (i32, i32, i32) {
    %c0_i32 = arith.constant 0 : i32
    return %arg0, %arg1, %arg2 : i32, i32, i32
  }
}

</mosaic_0001>

<bundles_post_ra>
// kernel: tpu_custom_call.1
= control target key start
LH: loop header
LB: loop body
LE: loop exit
PB: predicated region body
PF: predicated region fallthrough
CT: control target
= control target key end

     0   :  { %9 = vsyncpa [#allocation4], 0  ;;  %s1018_s0 = inlined_call_operand.vmem [shape: f32[2,4], index: 0, kind: input, shape index: {}]   ;;  %s1019_s1 = inlined_call_operand.vmem [shape: f32[2,4], index: 1, kind: input, shape index: {}]   ;;  %s1020_s2 = inlined_call_operand.vmem [shape: f32[16,1], index: 2, kind: input, shape index: {}]   ;;  %s1021_s3 = inlined_call_operand.vmem [shape: f32[1,128], index: 3, kind: input, shape index: {}]   ;;  %s1022_s4 = inlined_call_operand.hbm [shape: f32[2,16,128], index: 4, kind: output, shape index: {}]  }
   0x1   :  { %10 = vsyncpa [#allocation6], 0 }
   0x2   :  { %11 = vsyncpa [#allocation3], 0 }
   0x3   :  { %13 = vsyncpa [#allocation3 + $0x1], 0  ;;  %s841_s15 = smov 0   ;;  %s843_s16 = smov 0  }
   0x4   :  { %s845_s17 = smov 0   ;;  %s847_s18 = smov 0  }
   0x5   :  { %s849_s19 = smov 0   ;;  %s851_s20 = smov 0  }
   0x6 LB: > { %s569_s21 = sadd.s32 4294967295, %s808_s20   ;;  %s570_s22 = sadd.s32 4294967294, %s808_s20   ;;  %s808_s20 = sphi %s851_s20, %s19_s20   ;;  %s804_s19 = sphi %s849_s19, %s1040_s19   ;;  %s800_s18 = sphi %s847_s18, %s1039_s18   ;;  %s796_s17 = sphi %s845_s17, %s1038_s17   ;;  %s792_s16 = sphi %s843_s16, %s1037_s16   ;;  %s788_s15 = sphi %s841_s15, %s1036_s15  }
   0x7   : > { %s38_s23 = sadd.s32 1, %s804_s19  ;;  %s143_s24 = sadd.s32 1, %s796_s17 }
   0x8   : > { %p40_p0 = scmp.ge.s32.totalorder %s38_s23, 2  ;;  %p153_p1 = scmp.ne.s32.totalorder %s796_s17, %s792_s16 }
   0x9   : > { %p154_p2 = scmp.eq.s32.totalorder %s569_s21, 1  ;;  %p159_p3 = scmp.ne.s32.totalorder %s792_s16, %s788_s15 }
   0xa   : > { %s1042_s23 = smov (%p40_p0, %s38_s23), 0  ;;  %p160_p5 = scmp.eq.s32.totalorder %s570_s22, 1 }
   0xb   : > { %p881_p4 = por %p154_p2, %p153_p1  ;;  %s136_s26 = ssub.s32 %s804_s19, %s1042_s23 }
   0xc   : > { %p571_p6 = scmp.ge.s32.totalorder %s808_s20, 1  ;;  %p141_p7 = scmp.eq.s32.totalorder %s136_s26, 0 }
   0xd   : > { %s1027_s25 = scalar_select %p881_p4, 1, 0 }
   0xe   : > { %p888_p8 = por %p160_p5, %p159_p3  ;;  %p167_p9 = scmp.lt.s32.totalorder %s808_s20, 3 }
   0xf   : > { %s894_s28 = scalar_select %p141_p7, %s796_s17, %s143_s24  }
  0x10   : > { %s1028_s27 = scalar_select %p888_p8, 1, 0 }
  0x11   : > { %p896_p10 = pnand %p571_p6, %p167_p9  ;;  %p900_p11 = scmp.eq.s32.totalorder %s569_s21, 0 }
  0x12   : > { %s180_s7 = sshll.u32 %s1018_s0, 4  ;;  %s191_s10 = sshll.u32 %s1019_s1, 4  ;;  %s181_s7 = int_to_ptr.vmem [resolvable:$true] %s180_s7  ;;  %s192_s10 = int_to_ptr.vmem [resolvable:$true] %s191_s10 }
  0x13   : > { %s1029_s29 = scalar_select %p896_p10, 1, 0 }
  0x14   : > { %s1030_s30 = scalar_select %p900_p11, 1, 0 }
  0x15   : > { %p597_p12 = pneg %p896_p10  ;;  %s692_s12 = scalar_lea.vmem %s181_s7, 32 }
  0x16   : > { %p693_p0 = scmp.ne.s32.totalorder %s181_s7, %s692_s12  ;;  %p700_p5 = scmp.lt.s32.totalorder %s181_s7, %s181_s7 }
  0x17   : > { %p914_p13 = pnand %p900_p11, %p597_p12  ;;  %p701_p6 = scmp.lt.s32.totalorder %s692_s12, %s692_s12 }
  0x19   : > { %p694_p1 = pneg %p914_p13  ;;  %p702_p7 = por %p701_p6, %p700_p5 }
  0x1b   : > { %p695_p2 = pnand %p694_p1, %p693_p0 }
  0x1d   : > { %p696_p3 = pneg %p695_p2 }
  0x1f   : > { %p703_p9 = pnand %p702_p7, %p696_p3 }
  0x21   : > { %706 = shalt.err (!%p703_p9)
}
  0x22   : > { %s810_s13 = smov [#allocation2]   ;;  %s707_s14 = scalar_lea.vmem %s192_s10, 32 }
  0x23   : > { %600 = dma.vmem_to_smem (!%p914_p13), %s181_s7, 32, %s810_s13, [#allocation4]  }
  0x24   : > { %p708_p12 = scmp.ne.s32.totalorder %s192_s10, %s707_s14  ;;  %p715_p11 = scmp.lt.s32.totalorder %s192_s10, %s192_s10 }
  0x25   : > { %p716_p10 = scmp.lt.s32.totalorder %s707_s14, %s707_s14 }
  0x26   : > { %p710_p8 = pnand %p708_p12, %p694_p1 }
  0x27   : > { %p717_p0 = por %p716_p10, %p715_p11 }
  0x28   : > { %p711_p4 = pneg %p710_p8 }
  0x2a   : > { %p718_p2 = pnand %p717_p0, %p711_p4 }
  0x2c   : > { %721 = shalt.err (!%p718_p2)
}
  0x2d   : > { %s811_s21 = smov [#allocation5]   ;;  %p1032_p3 = scmp.ne.s32.totalorder %s1029_s29, 0 }
  0x2e   : > { %603 = dma.vmem_to_smem (!%p914_p13), %s192_s10, 32, %s811_s21, [#allocation6]  }
  0x2f   : > { %219 = sbr.rel (%p1032_p3) target bundleno = 254 (0xfe), region = 36  ;;  %p1033_p5 = scmp.ne.s32.totalorder (!%p1032_p3), %s1030_s30, 0 }
  0x36   : > { %775 = dma.done.wait (%p1033_p5), [#allocation4], 32  }
  0x37   : > { %777 = vsyncadd (%p1033_p5), [#allocation4], 4294967264 }
  0x38   : > { %779 = dma.done.wait (%p1033_p5), [#allocation6], 32  }
  0x39   : > { %781 = vsyncadd (%p1033_p5), [#allocation6], 4294967264 }
  0x3a   : > { %229 = sfence }
  0x3b   : > { %s935_s22 = sshll.u32 %s800_s18, 7  ;;  %v812_v0 = vmov 0   ;;  %v263_v1 = vld [vmem:[%s1020_s2] sm:$0xff]  ;;  %v264_v2 = vld [vmem:[%s1020_s2 + $0x8] sm:$0xff]  ;;  %p1034_p8 = scmp.ne.s32.totalorder %s1027_s25, 0 }
  0x3c   : > { %666 = vset.pattern.permute.xlu0 %v812_v0  ;;  %667 = vset.pattern.permute.xlu1 %v812_v0  ;;  %s267_s24 = sld [smem:[#allocation2 + %s935_s22]]  ;;  %s348_s26 = sadd.s32 2, %s935_s22  ;;  %v265_v47 = vld [vmem:[%s1021_s3] sm:$0x1] }
  0x3d   : > { %s349_s29 = sld [smem:[#allocation2 + %s348_s26]]  ;;  %s390_s30 = sadd.s32 3, %s935_s22 }
  0x3e   : > { %s391_s5 = sld [smem:[#allocation2 + %s390_s30]]  ;;  %s306_s6 = sadd.s32 1, %s935_s22 }
  0x3f   : > { %s307_s7 = sld [smem:[#allocation2 + %s306_s6]] }
  0x40   : > { %s271_s12 = sld [smem:[#allocation5 + %s935_s22]]  ;;  %s250_s22 = sand.u32 1, %s792_s16  }
  0x41   : > { %s311_s13 = sld [smem:[#allocation5 + %s306_s6]]  ;;  %s586_s6 = sshll.u32 %s800_s18, 8 }
  0x42   : > { %v268_v3 = vstv %s267_s24  ;;  %s353_s14 = sld [smem:[#allocation5 + %s348_s26]]  ;;  %s579_s26 = sshll.u32 %s250_s22, 4 }
  0x43   : > { %v269_v4 = vsub.f32 %v263_v1, %v268_v3  ;;  %v270_v5 = vsub.f32 %v264_v2, %v268_v3  ;;  %v350_v6 = vstv %s349_s29  ;;  %s395_s29 = sld [smem:[#allocation5 + %s390_s30]]  ;;  %s252_s30 = scalar_lea.vmem [#allocation7], %s579_s26 }
  0x44   : > { %v351_v7 = vsub.f32 %v263_v1, %v350_v6  ;;  %v392_v8 = vstv %s391_s5  ;;  %v352_v12 = vsub.f32 %v264_v2, %v350_v6  ;;  %s455_s5 = sshll.u32 %s252_s30, 4  ;;  %s970_s9 = scalar_lea.hbm %s1022_s4, %s586_s6  ;;  %s965_s5 = int_to_ptr.vmem [resolvable:$true] %s455_s5 }
  0x45   : > { %v274_v9 = vmul.f32 %v269_v4, %v269_v4  ;;  %v275_v10 = vmul.f32 %v270_v5, %v270_v5  ;;  %v393_v11 = vsub.f32 %v263_v1, %v392_v8  ;;  %v308_v14 = vstv %s307_s7  ;;  %s972_s10 = scalar_lea.sflag [#allocation3], %s250_s22  ;;  %s722_s11 = scalar_lea.vmem %s965_s5, 256 }
  0x46   : > { %v356_v13 = vmul.f32 %v351_v7, %v351_v7  ;;  %v309_v17 = vsub.f32 %v263_v1, %v308_v14  ;;  %v310_v18 = vsub.f32 %v264_v2, %v308_v14  ;;  %v357_v23 = vmul.f32 %v352_v12, %v352_v12  ;;  %p723_p4 = scmp.ne.s32.totalorder %s965_s5, %s722_s11  ;;  %s813_s18 = smov [#allocation7]  }
  0x47   : > { %v276_v15 = vmul.f32 -20.0, %v274_v9  ;;  %v277_v16 = vmul.f32 -20.0, %v275_v10  ;;  %v398_v22 = vmul.f32 %v393_v11, %v393_v11  ;;  %v394_v24 = vsub.f32 %v264_v2, %v392_v8 }
  0x48   : > { %v358_v21 = vmul.f32 -20.0, %v356_v13  ;;  %v314_v25 = vmul.f32 %v309_v17, %v309_v17  ;;  %v315_v26 = vmul.f32 %v310_v18, %v310_v18  ;;  %v359_v31 = vmul.f32 -20.0, %v357_v23  ;;  %p724_p10 = pnand %p723_p4, %p1034_p8 }
  0x49   : > { %v278_v19 = vmul.f32 1.442695, %v276_v15  ;;  %v280_v20 = vmul.f32 1.442695, %v277_v16  ;;  %v400_v30 = vmul.f32 -20.0, %v398_v22  ;;  %v399_v32 = vmul.f32 %v394_v24, %v394_v24 }
  0x4a   : > { %v316_v27 = vmul.f32 -20.0, %v314_v25  ;;  %v317_v28 = vmul.f32 -20.0, %v315_v26  ;;  %v360_v29 = vmul.f32 1.442695, %v358_v21  ;;  %v362_v36 = vmul.f32 1.442695, %v359_v31  ;;  %p725_p11 = pneg %p724_p10 }
  0x4b   : > { %668 = vpow2.f32 %v278_v19  ;;  %v402_v35 = vmul.f32 1.442695, %v400_v30  ;;  %v401_v37 = vmul.f32 -20.0, %v399_v32  ;;  %v272_v48 = vstv %s271_s12  ;;  %s726_s12 = sshll.u32 %s813_s18, 4  ;;  %s727_s12 = int_to_ptr.vmem [resolvable:$false] %s726_s12 }
  0x4c   : > { %670 = vpow2.f32 %v280_v20  ;;  %v318_v33 = vmul.f32 1.442695, %v316_v27  ;;  %v320_v34 = vmul.f32 1.442695, %v317_v28  ;;  %v273_v49 = vsub.f32 %v265_v47, %v272_v48  ;;  %p729_p13 = scmp.lt.s32.totalorder %s965_s5, %s727_s12 }
  0x4d   : > { %v404_v39 = vmul.f32 1.442695, %v401_v37  ;;  %v312_v50 = vstv %s311_s13  ;;  %v354_v53 = vstv %s353_s14  ;;  %v396_v57 = vstv %s395_s29  ;;  %s728_s13 = scalar_lea.vmem %s727_s12, 512 }
  0x4e   : > { %672 = vpow2.f32 %v318_v33  ;;  %v282_v51 = vmul.f32 %v273_v49, %v273_v49  ;;  %v313_v52 = vsub.f32 %v265_v47, %v312_v50  ;;  %v355_v54 = vsub.f32 %v265_v47, %v354_v53  ;;  %p730_p1 = scmp.lt.s32.totalorder %s728_s13, %s722_s11 }
  0x4f   : > { %674 = vpow2.f32 %v360_v29  ;;  %v397_v59 = vsub.f32 %v265_v47, %v396_v57  ;;  %v297_v1 = vlaneseq }
  0x50   : > { %676 = vpow2.f32 %v320_v34  ;;  %v283_v55 = vmul.f32 -20.0, %v282_v51  ;;  %v322_v56 = vmul.f32 %v313_v52, %v313_v52  ;;  %v364_v58 = vmul.f32 %v355_v54, %v355_v54  ;;  %p731_p6 = por %p730_p1, %p729_p13 }
  0x51   : > { %678 = vpow2.f32 %v402_v35  ;;  %v406_v63 = vmul.f32 %v397_v59, %v397_v59  ;;  %v298_v4 = vshrl.u32 %v297_v1, 7 }
  0x52   : > { %680 = vpow2.f32 %v362_v36  ;;  %v284_v60 = vmul.f32 1.442695, %v283_v55  ;;  %v323_v61 = vmul.f32 -20.0, %v322_v56  ;;  %v365_v62 = vmul.f32 -20.0, %v364_v58  ;;  %p732_p7 = pnand %p731_p6, %p725_p11 }
  0x53   : > { %682 = vpow2.f32 %v404_v39  ;;  %v407_v3 = vmul.f32 -20.0, %v406_v63  ;;  %v299_v6 = vsub.s32 0, %v298_v4 }
  0x54   : > { %684 = vpow2.f32 %v284_v60  ;;  %v324_v0 = vmul.f32 1.442695, %v323_v61  ;;  %v366_v2 = vmul.f32 1.442695, %v365_v62 }
  0x55   : > { %v669_v38 = vpop.eup %668  ;;  %v408_v5 = vmul.f32 1.442695, %v407_v3 }
  0x56   : > { %288 = vperm.xlu0 %666, %v669_v38   ;;  %v671_v40 = vpop.eup %670  ;;  %686 = vpow2.f32 %v324_v0 }
  0x57   : > { %688 = vpow2.f32 %v366_v2 }
  0x58   : > { %v673_v41 = vpop.eup %672  ;;  %690 = vpow2.f32 %v408_v5 }
  0x59   : > { %v675_v42 = vpop.eup %674  ;;  %328 = vperm.xlu1 %667, %v673_v41  }
  0x5a   : > { %293 = vperm.xlu0 %666, %v671_v40   ;;  %v677_v43 = vpop.eup %676 }
  0x5b   : > { %v679_v44 = vpop.eup %678 }
  0x5c   : > { %v681_v45 = vpop.eup %680 }
  0x5d   : > { %333 = vperm.xlu1 %667, %v677_v43   ;;  %v683_v46 = vpop.eup %682 }
  0x5e   : > { %370 = vperm.xlu0 %666, %v675_v42   ;;  %v685_v7 = vpop.eup %684 }
  0x5f   : > { %v300_v8 = vrot.slane %v685_v7, %v299_v6 }
  0x60   : > { %v687_v9 = vpop.eup %686 }
  0x61   : > { %375 = vperm.xlu1 %667, %v681_v45   ;;  %v689_v11 = vpop.eup %688  ;;  %v340_v13 = vrot.slane %v687_v9, %v299_v6 }
  0x62   : > { %412 = vperm.xlu0 %666, %v679_v44   ;;  %v382_v16 = vrot.slane %v689_v11, %v299_v6  ;;  %v691_v17 = vpop.eup %690 }
  0x63   : > { %v424_v25 = vrot.slane %v691_v17, %v299_v6 }
  0x65   : > { %417 = vperm.xlu1 %667, %v683_v46  }
  0xd5   : > { %v289_v10 = vpop.permute.xlu0 %288 }
  0xd6   : > { %v302_v12 = vmul.f32 %v300_v8, %v289_v10 }
  0xd8   : > { %v329_v15 = vpop.permute.xlu1 %328  ;;  %v304_v18 = vsub.f32 1.0, %v302_v12 }
  0xd9   : > { %v294_v14 = vpop.permute.xlu0 %293  ;;  %v342_v19 = vmul.f32 %v340_v13, %v329_v15 }
  0xda   : > { %v303_v20 = vmul.f32 %v300_v8, %v294_v14 }
  0xdb   : > { %v344_v21 = vsub.f32 1.0, %v342_v19 }
  0xdc   : > { %v334_v23 = vpop.permute.xlu1 %333  ;;  %v305_v27 = vsub.f32 1.0, %v303_v20 }
  0xdd   : > { %v371_v22 = vpop.permute.xlu0 %370  ;;  %v346_v26 = vmul.f32 %v344_v21, %v304_v18  ;;  %v343_v28 = vmul.f32 %v340_v13, %v334_v23 }
  0xde   : > { %v384_v24 = vmul.f32 %v382_v16, %v371_v22 }
  0xdf   : > { %v345_v30 = vsub.f32 1.0, %v343_v28 }
  0xe0   : > { %v386_v29 = vsub.f32 1.0, %v384_v24  ;;  %v376_v33 = vpop.permute.xlu1 %375 }
  0xe1   : > { %v413_v31 = vpop.permute.xlu0 %412  ;;  %v347_v35 = vmul.f32 %v345_v30, %v305_v27  ;;  %v385_v36 = vmul.f32 %v382_v16, %v376_v33 }
  0xe2   : > { %v388_v32 = vmul.f32 %v386_v29, %v346_v26  ;;  %v426_v34 = vmul.f32 %v424_v25, %v413_v31 }
  0xe3   : > { %v387_v38 = vsub.f32 1.0, %v385_v36 }
  0xe4   : > { %v428_v37 = vsub.f32 1.0, %v426_v34  ;;  %v418_v40 = vpop.permute.xlu1 %417 }
  0xe5   : > { %v389_v41 = vmul.f32 %v387_v38, %v347_v35  ;;  %v427_v42 = vmul.f32 %v424_v25, %v418_v40 }
  0xe6   : > { %v430_v39 = vmul.f32 %v428_v37, %v388_v32 }
  0xe7   : > { %v429_v44 = vsub.f32 1.0, %v427_v42 }
  0xe8   : > { %v432_v43 = vsub.f32 1.0, %v430_v39 }
  0xe9   : > { %v431_v46 = vmul.f32 %v429_v44, %v389_v41 }
  0xea   : > { %v434_v45 = vmul.f32 2.0, %v432_v43 }
  0xeb   : > { %v433_v47 = vsub.f32 1.0, %v431_v46 }
  0xec   : > { %436 = vst [vmem:[%s252_s30] sm:$0xff] %v434_v45 }
  0xed   : > { %v435_v48 = vmul.f32 2.0, %v433_v47 }
  0xef   : > { %437 = vst [vmem:[%s252_s30 + $0x8] sm:$0xff] %v435_v48 }
  0xf0   : > { %735 = shalt.err (!%p732_p7)
}
  0xf1   : > { %s736_s14 = scalar_lea.hbm %s970_s9, 256  ;;  %s740_s29 = scalar_lea.hbm %s1022_s4, 512 }
  0xf2   : > { %p737_p9 = scmp.ne.s32.totalorder %s970_s9, %s736_s14  ;;  %p741_p2 = scmp.lt.u32.totalorder %s970_s9, %s1022_s4 }
  0xf3   : > { %p742_p3 = scmp.lt.u32.totalorder %s740_s29, %s736_s14  ;;  %p744_p4 = scmp.lt.u32.totalorder %s736_s14, %s970_s9 }
  0xf4   : > { %p738_p12 = pnand %p737_p9, %p1034_p8 }
  0xf5   : > { %p743_p5 = por %p742_p3, %p741_p2 }
  0xf6   : > { %p739_p0 = pneg %p738_p12 }
  0xf7   : > { %p745_p10 = por %p744_p4, %p743_p5 }
  0xf9   : > { %p746_p11 = pnand %p745_p10, %p739_p0 }
  0xfb   : > { %749 = shalt.err (!%p746_p11)
}
  0xfc   : > { %s814_s30 = smov 128   ;;  %s815_s6 = smov 8  }
  0xfd   : > { %595 = dma.vmem_to_hbm [thread:$0]  (%p1034_p8), %s965_s5, 256, %s970_s9, %s972_s10, %s814_s30, %s814_s30, %s815_s6  }
  0xfe PF: > { %p612_p13 = scmp.ge.s32.totalorder %s808_s20, 2  ;;  %s470_s7 = sand.u32 1, %s788_s15  }
  0xff   : > { %p1035_p1 = scmp.ne.s32.totalorder %s1028_s27, 0  ;;  %s471_s8 = scalar_lea.sflag [#allocation3], %s470_s7 }
 0x101   : > { %p605_p6 = pnand %p612_p13, %p1035_p1 }
 0x103   : > { %783 = dma.done.wait (!%p605_p6), %s471_s8, 256  }
 0x104   : > { %785 = vsyncadd (!%p605_p6), %s471_s8, 4294967040  ;;  %s19_s20 = sadd.s32 1, %s808_s20   ;;  %s1036_s15 = smov %s792_s16 }
 0x105   : > { %p16_p7 = scmp.ge.s32.totalorder %s19_s20, 4   ;;  %s1037_s16 = smov %s796_s17 }
 0x106   : > { %s1038_s17 = smov %s894_s28  ;;  %s1039_s18 = smov %s804_s19 }
 0x107   : > { %s1040_s19 = smov %s1042_s23  ;;  %18 = sbr.rel (!%p16_p7) target bundleno = 6 (0x6), region = 83 }
 0x10e   :  { %476 = vsyncpa [#allocation3], 1 }
 0x10f   :  { %478 = vsyncpa [#allocation3 + $0x1], 1 }
 0x110   :  { %479 = vsyncpa [#allocation4], 1 }
 0x111   :  { %481 = vsyncpa [#allocation4 + $0x1], 1 }
 0x112   :  { %482 = vsyncpa [#allocation6], 1 }

</bundles_post_ra>
